<compile_context>
chip_gen: v6e
topology: v6e:2x2x1
jax: 0.10.0
libtpu: 0.0.40
codegen_flags: <defaults>
</compile_context>

<pallas_src>
import functools

import jax
import jax.numpy as jnp
from jax.experimental import pallas as pl
from jax.experimental.pallas import tpu as pltpu


_LANE = 128
# Combined (logits + mask) bytes streamed per grid step.  2-4 MiB blocks
# already reach ~85% of the HBM roofline; larger blocks only bloat the
# double-buffered VMEM footprint and hurt pipeline overlap on small grids.
_TARGET_BLOCK_BYTES = 3 * 1024 * 1024
_MAX_BLOCK_BYTES = 4 * 1024 * 1024


def _cdiv(a, b):
    return (a + b - 1) // b


def _round_up(x, m):
    return ((x + m - 1) // m) * m


def _sublane_align(dtype):
    # Minimum sublane multiple for a non-full-extent block of this dtype:
    # f32 -> 8, bf16 -> 16, int8/bool/fp8 -> 32.
    return max(8, 32 // jnp.dtype(dtype).itemsize)


def _soft_dice_kernel(logits_ref, mask_ref, dc_ref, tp_ref, denom_ref,
                      *, smooth, hw, hw_tile, mask_lanes):
    """Grid = (row tiles [parallel], HW tiles [reduction, innermost]).

    tp_ref / denom_ref : (row_tile, 1) per-row partials over the HW tiles.
    dc_ref             : (row_tile, 1) per-row dice coefficient (written on
                         the last HW step); the wrapper does 1 - mean().
    """
    hi = pl.program_id(1)
    last_h = pl.num_programs(1) - 1

    @pl.when(hi == 0)
    def _():
        tp_ref[...] = jnp.zeros_like(tp_ref)
        denom_ref[...] = jnp.zeros_like(denom_ref)

    x = logits_ref[...].astype(jnp.float32)
    m = mask_ref[...].astype(jnp.float32)

    # sigmoid = 1 / (1 + exp(-x)): exp and the approximate reciprocal both run
    # on the EUP slot, keeping the VALU free for the reductions (matters once
    # inputs are bf16/int8 and the element rate rises; also keeps v5e
    # memory-bound rather than EUP/VALU-bound).
    p = pl.reciprocal(1.0 + jnp.exp(-x), approx=True)

    if mask_lanes:
        # Ragged last HW block: zero out-of-bounds lanes *before* the multiply
        # and the reductions so OOB garbage (possibly NaN/Inf) never enters
        # the sums.
        lane = jax.lax.broadcasted_iota(jnp.int32, x.shape, 1) + hi * hw_tile
        valid = lane < hw
        p = jnp.where(valid, p, 0.0)
        m = jnp.where(valid, m, 0.0)

    # 2*tp + fp + fn == sum(p) + sum(m): two lane reductions per slab.
    tp_ref[...] += jnp.sum(p * m, axis=-1, keepdims=True)
    denom_ref[...] += jnp.sum(p + m, axis=-1, keepdims=True)

    @pl.when(hi == last_h)
    def _():
        # Rows past n_rows in a ragged last row tile produce garbage dc here;
        # the wrapper slices them off before the mean.
        dc_ref[...] = (2.0 * tp_ref[...] + smooth) / (denom_ref[...] + smooth)


def soft_dice_loss(logits, mask, smooth=1.0):
    """Pallas implementation of SoftDiceLoss.forward with dims=(-2, -1).

    logits, mask: (B, C, H, W) (NCHW, matching the PyTorch module).
    Inputs keep their dtype on the HBM side (bf16 logits / int8 or bool masks
    stream ~2.7x fewer bytes than f32+f32); the kernel upcasts to float32.
    Returns a float32 scalar.
    """
    B, C, H, W = logits.shape
    assert mask.shape == logits.shape
    n_rows = B * C
    hw = H * W

    # Row-major reshape (B, C, H, W) -> (B*C, H*W) is a free view.
    logits2d = logits.reshape(n_rows, hw)
    mask2d = mask.reshape(n_rows, hw)

    elem_bytes = (jnp.dtype(logits2d.dtype).itemsize
                  + jnp.dtype(mask2d.dtype).itemsize)
    row_align = max(_sublane_align(logits2d.dtype),
                    _sublane_align(mask2d.dtype))

    min_slab_bytes = row_align * hw * elem_bytes
    if min_slab_bytes > _MAX_BLOCK_BYTES:
        # Very large images: tile the spatial axis too.  Spread hw as evenly
        # as possible over lane-aligned tiles to minimise dead lanes.
        row_tile = row_align
        n_hw_tiles = _cdiv(min_slab_bytes, _TARGET_BLOCK_BYTES)
        hw_tile = max(_LANE, _round_up(_cdiv(hw, n_hw_tiles), _LANE))
        if hw_tile >= hw:
            hw_tile = hw
    else:
        # Whole rows fit comfortably: grow the row tile toward the budget but
        # keep >= ~4 row tiles (pipeline overlap + megacore) when rows allow.
        hw_tile = hw
        row_tile = max(row_align,
                       (_TARGET_BLOCK_BYTES // (hw * elem_bytes))
                       // row_align * row_align)
        row_tile = min(row_tile,
                       max(row_align, _round_up(_cdiv(n_rows, 4), row_align)))
    if row_tile >= n_rows:
        # Single row tile: use the full extent (exempt from sublane-alignment
        # rules), so no dead rows are ever streamed.
        row_tile = n_rows

    grid_r = _cdiv(n_rows, row_tile)
    grid_h = _cdiv(hw, hw_tile)
    mask_lanes = (hw % hw_tile) != 0

    kernel = functools.partial(
        _soft_dice_kernel,
        smooth=float(smooth),
        hw=hw,
        hw_tile=hw_tile,
        mask_lanes=mask_lanes,
    )

    # Double-buffered inputs + small headroom; comfortably under every
    # generation's scoped-VMEM ceiling (incl. v7x's 64 MiB per TC).
    in_block_bytes = row_tile * hw_tile * elem_bytes
    vmem_limit = int(min(40 * 1024 * 1024,
                         max(16 * 1024 * 1024,
                             2 * in_block_bytes + 4 * 1024 * 1024)))

    dc = pl.pallas_call(
        kernel,
        out_shape=jax.ShapeDtypeStruct((grid_r * row_tile, 1), jnp.float32),
        grid_spec=pltpu.PrefetchScalarGridSpec(
            num_scalar_prefetch=0,
            grid=(grid_r, grid_h),
            in_specs=[
                pl.BlockSpec((row_tile, hw_tile), lambda r, h: (r, h)),
                pl.BlockSpec((row_tile, hw_tile), lambda r, h: (r, h)),
            ],
            out_specs=pl.BlockSpec((row_tile, 1), lambda r, h: (r, 0)),
            scratch_shapes=[
                pltpu.VMEM((row_tile, 1), jnp.float32),  # tp partials
                pltpu.VMEM((row_tile, 1), jnp.float32),  # sum(p)+sum(m)
            ],
        ),
        compiler_params=pltpu.CompilerParams(
            # Row tiles are independent -> parallel (splits across the two
            # TensorCores on v7x); HW axis carries the reduction -> arbitrary.
            dimension_semantics=("parallel", "arbitrary"),
            vmem_limit_bytes=vmem_limit,
        ),
    )(logits2d, mask2d)

    # Drop rows that only exist because of a ragged last row tile, then take
    # the mean in the wrapper (tiny XLA ops on an (n_rows,) vector).
    return 1.0 - jnp.mean(dc[:n_rows, 0])


def soft_dice_loss_ref(logits, mask, smooth=1.0):
    """Pure-JAX reference mirroring the PyTorch forward exactly."""
    probs = jax.nn.sigmoid(logits.astype(jnp.float32))
    mask = mask.astype(jnp.float32)
    tp = jnp.sum(probs * mask, axis=(-2, -1))
    fp = jnp.sum(probs * (1.0 - mask), axis=(-2, -1))
    fn = jnp.sum((1.0 - probs) * mask, axis=(-2, -1))
    dc = (2.0 * tp + smooth) / (2.0 * tp + fp + fn + smooth)
    return 1.0 - jnp.mean(dc)


if __name__ == "__main__":
    key = jax.random.PRNGKey(0)
    k1, k2 = jax.random.split(key)

    # Tolerance accounts for the approx-reciprocal sigmoid (EUP), whose
    # relative error (~1e-4) is negligible for a scalar loss.
    TOL = dict(rtol=2e-3, atol=2e-3)

    # 1) f32 logits / f32 mask, aligned row count.
    B, C, H, W = 2, 4, 16, 16
    logits = jax.random.normal(k1, (B, C, H, W), dtype=jnp.float32)
    mask = (jax.random.uniform(k2, (B, C, H, W)) > 0.5).astype(jnp.float32)
    loss = jax.block_until_ready(soft_dice_loss(logits, mask, smooth=1.0))
    ref = soft_dice_loss_ref(logits, mask, smooth=1.0)
    assert jnp.allclose(loss, ref, **TOL), (loss, ref)

    # 2) Ragged row count (n_rows % 8 != 0) -> exercises the ragged row tile.
    B2, C2, H2, W2 = 3, 3, 16, 16
    l2 = jax.random.normal(k1, (B2, C2, H2, W2), dtype=jnp.float32)
    m2 = (jax.random.uniform(k2, (B2, C2, H2, W2)) > 0.5).astype(jnp.float32)
    loss2 = jax.block_until_ready(soft_dice_loss(l2, m2, smooth=1.0))
    ref2 = soft_dice_loss_ref(l2, m2, smooth=1.0)
    assert jnp.allclose(loss2, ref2, **TOL), (loss2, ref2)

    # 3) Narrow dtypes (bf16 logits + int8 mask): ~2.7x less HBM traffic.
    B3, C3, H3, W3 = 2, 4, 32, 32
    l3 = jax.random.normal(k1, (B3, C3, H3, W3), dtype=jnp.bfloat16)
    m3 = (jax.random.uniform(k2, (B3, C3, H3, W3)) > 0.5).astype(jnp.int8)
    loss3 = jax.block_until_ready(soft_dice_loss(l3, m3, smooth=1.0))
    ref3 = soft_dice_loss_ref(l3, m3, smooth=1.0)
    assert jnp.allclose(loss3, ref3, **TOL), (loss3, ref3)

    # 4) Large spatial extent -> exercises HW tiling + ragged lane masking.
    B4, C4, H4, W4 = 2, 4, 260, 260
    l4 = jax.random.normal(k1, (B4, C4, H4, W4), dtype=jnp.float32)
    m4 = (jax.random.uniform(k2, (B4, C4, H4, W4)) > 0.5).astype(jnp.float32)
    loss4 = jax.block_until_ready(soft_dice_loss(l4, m4, smooth=1.0))
    ref4 = soft_dice_loss_ref(l4, m4, smooth=1.0)
    assert jnp.allclose(loss4, ref4, **TOL), (loss4, ref4)

    print("KERNEL_OK")
</pallas_src>

<mosaic_0001>
module attributes {stable_mosaic.version = 11 : i64} {
  func.func @_soft_dice_kernel(%arg0: i32, %arg1: i32, %arg2: memref<8x256xf32, #tpu.memory_space<vmem>>, %arg3: memref<8x256xf32, #tpu.memory_space<vmem>>, %arg4: memref<8x1xf32, #tpu.memory_space<vmem>>, %arg5: memref<8x1xf32, #tpu.memory_space<vmem>>, %arg6: memref<8x1xf32, #tpu.memory_space<vmem>>) attributes {dimension_semantics = [#tpu.dimension_semantics<parallel>, #tpu.dimension_semantics<arbitrary>], iteration_bounds = array<i64: 1, 1>, scalar_prefetch = 0 : i64, scratch_operands = 2 : i64, tpu.core_type = #tpu.core_type<tc>, window_params = [{transform_indices = @transform_0, window_bounds = array<i64: 8, 256>}, {transform_indices = @transform_1, window_bounds = array<i64: 8, 256>}, {transform_indices = @transform_2, window_bounds = array<i64: 8, 1>}]} {
    %c0_i32 = arith.constant 0 : i32
    %0 = arith.cmpi eq, %arg1, %c0_i32 : i32
    %1 = arith.extui %0 : i1 to i32
    %c0_i32_0 = arith.constant 0 : i32
    %2 = arith.cmpi ne, %1, %c0_i32_0 : i32
    scf.if %2 {
      %cst_17 = arith.constant 0.000000e+00 : f32
      %26 = vector.broadcast %cst_17 : f32 to vector<8x1xf32>
      %c0_18 = arith.constant 0 : index
      %c0_19 = arith.constant 0 : index
      %27 = vector.load %arg5[%c0_18, %c0_19] : memref<8x1xf32, #tpu.memory_space<vmem>>, vector<8x1xf32>
      tpu.vector_store %arg5[%c0_18, %c0_19], %26 {strides = array<i32>} : memref<8x1xf32, #tpu.memory_space<vmem>>, vector<8x1xf32>,
      %cst_20 = arith.constant 0.000000e+00 : f32
      %28 = vector.broadcast %cst_20 : f32 to vector<8x1xf32>
      %c0_21 = arith.constant 0 : index
      %c0_22 = arith.constant 0 : index
      %29 = vector.load %arg6[%c0_21, %c0_22] : memref<8x1xf32, #tpu.memory_space<vmem>>, vector<8x1xf32>
      tpu.vector_store %arg6[%c0_21, %c0_22], %28 {strides = array<i32>} : memref<8x1xf32, #tpu.memory_space<vmem>>, vector<8x1xf32>,
    } else {
    }
    %c0 = arith.constant 0 : index
    %c0_1 = arith.constant 0 : index
    %3 = vector.load %arg2[%c0, %c0_1] : memref<8x256xf32, #tpu.memory_space<vmem>>, vector<8x256xf32>
    %c0_2 = arith.constant 0 : index
    %c0_3 = arith.constant 0 : index
    %4 = vector.load %arg3[%c0_2, %c0_3] : memref<8x256xf32, #tpu.memory_space<vmem>>, vector<8x256xf32>
    %cst = arith.constant 0.000000e+00 : f32
    %5 = vector.broadcast %cst : f32 to vector<8x256xf32>
    %6 = arith.subf %5, %3 : vector<8x256xf32>
    %7 = math.exp %6 : vector<8x256xf32>
    %cst_4 = arith.constant 1.000000e+00 : f32
    %8 = vector.broadcast %cst_4 : f32 to vector<8x256xf32>
    %9 = arith.addf %8, %7 : vector<8x256xf32>
    %10 = tpu.reciprocal %9 {approx = true} : vector<8x256xf32> -> vector<8x256xf32>
    %c0_5 = arith.constant 0 : index
    %c0_6 = arith.constant 0 : index
    %11 = vector.load %arg5[%c0_5, %c0_6] : memref<8x1xf32, #tpu.memory_space<vmem>>, vector<8x1xf32>
    %12 = arith.mulf %10, %4 : vector<8x256xf32>
    %cst_7 = arith.constant dense<0.000000e+00> : vector<8xf32>
    %13 = vector.multi_reduction <add>, %12, %cst_7 [1] : vector<8x256xf32> to vector<8xf32>
    %14 = vector.shape_cast %13 : vector<8xf32> to vector<8x1xf32>
    %15 = arith.addf %11, %14 : vector<8x1xf32>
    %c0_8 = arith.constant 0 : index
    %c0_9 = arith.constant 0 : index
    %16 = vector.load %arg5[%c0_8, %c0_9] : memref<8x1xf32, #tpu.memory_space<vmem>>, vector<8x1xf32>
    tpu.vector_store %arg5[%c0_8, %c0_9], %15 {strides = array<i32>} : memref<8x1xf32, #tpu.memory_space<vmem>>, vector<8x1xf32>,
    %c0_10 = arith.constant 0 : index
    %c0_11 = arith.constant 0 : index
    %17 = vector.load %arg6[%c0_10, %c0_11] : memref<8x1xf32, #tpu.memory_space<vmem>>, vector<8x1xf32>
    %18 = arith.addf %10, %4 : vector<8x256xf32>
    %cst_12 = arith.constant dense<0.000000e+00> : vector<8xf32>
    %19 = vector.multi_reduction <add>, %18, %cst_12 [1] : vector<8x256xf32> to vector<8xf32>
    %20 = vector.shape_cast %19 : vector<8xf32> to vector<8x1xf32>
    %21 = arith.addf %17, %20 : vector<8x1xf32>
    %c0_13 = arith.constant 0 : index
    %c0_14 = arith.constant 0 : index
    %22 = vector.load %arg6[%c0_13, %c0_14] : memref<8x1xf32, #tpu.memory_space<vmem>>, vector<8x1xf32>
    tpu.vector_store %arg6[%c0_13, %c0_14], %21 {strides = array<i32>} : memref<8x1xf32, #tpu.memory_space<vmem>>, vector<8x1xf32>,
    %c0_i32_15 = arith.constant 0 : i32
    %23 = arith.cmpi eq, %arg1, %c0_i32_15 : i32
    %24 = arith.extui %23 : i1 to i32
    %c0_i32_16 = arith.constant 0 : i32
    %25 = arith.cmpi ne, %24, %c0_i32_16 : i32
    scf.if %25 {
      %c0_17 = arith.constant 0 : index
      %c0_18 = arith.constant 0 : index
      %26 = vector.load %arg5[%c0_17, %c0_18] : memref<8x1xf32, #tpu.memory_space<vmem>>, vector<8x1xf32>
      %cst_19 = arith.constant 2.000000e+00 : f32
      %27 = vector.broadcast %cst_19 : f32 to vector<8x1xf32>
      %28 = arith.mulf %27, %26 : vector<8x1xf32>
      %cst_20 = arith.constant 1.000000e+00 : f32
      %29 = vector.broadcast %cst_20 : f32 to vector<8x1xf32>
      %30 = arith.addf %28, %29 : vector<8x1xf32>
      %c0_21 = arith.constant 0 : index
      %c0_22 = arith.constant 0 : index
      %31 = vector.load %arg6[%c0_21, %c0_22] : memref<8x1xf32, #tpu.memory_space<vmem>>, vector<8x1xf32>
      %cst_23 = arith.constant 1.000000e+00 : f32
      %32 = vector.broadcast %cst_23 : f32 to vector<8x1xf32>
      %33 = arith.addf %31, %32 : vector<8x1xf32>
      %34 = arith.divf %30, %33 : vector<8x1xf32>
      %c0_24 = arith.constant 0 : index
      %c0_25 = arith.constant 0 : index
      %35 = vector.load %arg4[%c0_24, %c0_25] : memref<8x1xf32, #tpu.memory_space<vmem>>, vector<8x1xf32>
      tpu.vector_store %arg4[%c0_24, %c0_25], %34 {strides = array<i32>} : memref<8x1xf32, #tpu.memory_space<vmem>>, vector<8x1xf32>,
    } else {
    }
    return
  }
  func.func @transform_0(%arg0: i32, %arg1: i32) -> (i32, i32) {
    %c0_i32 = arith.constant 0 : i32
    return %arg0, %arg1 : i32, i32
  }
  func.func @transform_1(%arg0: i32, %arg1: i32) -> (i32, i32) {
    %c0_i32 = arith.constant 0 : i32
    return %arg0, %arg1 : i32, i32
  }
  func.func @transform_2(%arg0: i32, %arg1: i32) -> (i32, i32) {
    %c0_i32 = arith.constant 0 : i32
    %c0_i32_0 = arith.constant 0 : i32
    return %arg0, %c0_i32 : i32, i32
  }
}

</mosaic_0001>

<bundles_post_ra>
// kernel: tpu_custom_call.1
= control target key start
LH: loop header
LB: loop body
LE: loop exit
PB: predicated region body
PF: predicated region fallthrough
CT: control target
= control target key end

     0   :  { %7 = vsyncpa [#allocation5], 0  ;;  %s179_s0 = inlined_call_operand.hbm [shape: f32[8,256], index: 0, kind: input, shape index: {}]   ;;  %s180_s1 = inlined_call_operand.hbm [shape: f32[8,256], index: 1, kind: input, shape index: {}]   ;;  %s181_s2 = inlined_call_operand.vmem [shape: f32[8,1], index: 2, kind: output, shape index: {}]  }
   0x1   :  { %8 = vsyncpa [#allocation7], 0  ;;  %s147_s9 = smov [#allocation4]   ;;  %s148_s11 = smov [#allocation6]  }
   0x2   :  { %s15_s10 = sshll.u32 %s147_s9, 4  ;;  %s25_s12 = sshll.u32 %s148_s11, 4  ;;  %s16_s10 = int_to_ptr.vmem [resolvable:$true] %s15_s10  ;;  %s26_s12 = int_to_ptr.vmem [resolvable:$true] %s25_s12 }
   0x3   :  { %s111_s13 = scalar_lea.vmem %s16_s10, 256  ;;  %p116_p1 = scmp.lt.s32.totalorder %s16_s10, %s16_s10 }
   0x4   :  { %p112_p0 = scmp.ne.s32.totalorder %s16_s10, %s111_s13  ;;  %p117_p2 = scmp.lt.s32.totalorder %s111_s13, %s111_s13 }
   0x6   :  { %p118_p3 = por %p117_p2, %p116_p1 }
   0x8   :  { %p119_p4 = pnand %p118_p3, %p112_p0 }
   0xa   :  { %122 = shalt.err (!%p119_p4)
}
   0xb   :  { %18 = dma.hbm_to_vmem [thread:$0]  %s179_s0, 256, %s16_s10, [#allocation5]  }
   0xc   :  { %s131_s16 = scalar_lea.vmem %s26_s12, 256  ;;  %p136_p6 = scmp.lt.s32.totalorder %s26_s12, %s26_s12 }
   0xd   :  { %p132_p5 = scmp.ne.s32.totalorder %s26_s12, %s131_s16  ;;  %p137_p7 = scmp.lt.s32.totalorder %s131_s16, %s131_s16 }
   0xf   :  { %p138_p8 = por %p137_p7, %p136_p6 }
  0x11   :  { %p139_p9 = pnand %p138_p8, %p132_p5 }
  0x13   :  { %142 = shalt.err (!%p139_p9)
}
  0x14   :  { %28 = dma.hbm_to_vmem [thread:$0]  %s180_s1, 256, %s26_s12, [#allocation7]  }
  0x15   :  { %143 = dma.done.wait [#allocation5], 256  }
  0x16   :  { %144 = vsyncadd [#allocation5], 4294967040 }
  0x17   :  { %145 = dma.done.wait [#allocation7], 256  }
  0x18   :  { %146 = vsyncadd [#allocation7], 4294967040  ;;  %vm39_vm0 = vcmask 7168   ;;  %v149_v0 = vmov 0.0   ;;  %v42_v1 = vld [vmem:[#allocation4] sm:$0xff]  ;;  %v43_v2 = vld [vmem:[#allocation4 + $0x8] sm:$0xff] }
  0x19   :  { %41 = vst.msk [vmem:[#allocation3] sm:$0xff] %vm39_vm0, %v149_v0  ;;  %40 = vst.msk [vmem:[#allocation2] sm:$0xff] %vm39_vm0, %v149_v0  ;;  %v46_v3 = vsub.f32 0.0, %v42_v1  ;;  %v47_v4 = vsub.f32 0.0, %v43_v2  ;;  %v44_v11 = vld [vmem:[#allocation6] sm:$0xff]  ;;  %v45_v12 = vld [vmem:[#allocation6 + $0x8] sm:$0xff] }
  0x1b   :  { %v48_v5 = vmul.f32 1.442695, %v46_v3  ;;  %v50_v6 = vmul.f32 1.442695, %v47_v4 }
  0x1d   :  { %93 = vpow2.f32 %v48_v5 }
  0x1e   :  { %95 = vpow2.f32 %v50_v6 }
  0x20   :  { %v65_v21 = vld [vmem:[#allocation3] sm:$0xff]  ;;  %v56_v24 = vld [vmem:[#allocation2] sm:$0xff] }
  0x2a   :  { %v94_v7 = vpop.eup %93 }
  0x2b   :  { %v96_v8 = vpop.eup %95  ;;  %v52_v9 = vadd.f32 1.0, %v94_v7 }
  0x2c   :  { %v53_v10 = vadd.f32 1.0, %v96_v8 }
  0x2d   :  { %97 = vrcp.f32 %v52_v9 }
  0x2e   :  { %99 = vrcp.f32 %v53_v10 }
  0x3a   :  { %v98_v13 = vpop.eup %97 }
  0x3b   :  { %v100_v14 = vpop.eup %99  ;;  %v66_v15 = vadd.f32 %v98_v13, %v44_v11  ;;  %v57_v17 = vmul.f32 %v98_v13, %v44_v11 }
  0x3c   :  { %v67_v16 = vadd.f32 %v100_v14, %v45_v12  ;;  %v58_v18 = vmul.f32 %v100_v14, %v45_v12 }
  0x3e   :  { %v68_v19 = vadd.f32 %v67_v16, %v66_v15  ;;  %v59_v20 = vadd.f32 %v58_v18, %v57_v17 }
  0x40   :  { %69 = vadd.xlane.f32.xlu0 %v68_v19 }
  0x44   :  { %60 = vadd.xlane.f32.xlu0 %v59_v20 }
  0xc9   :  { %v70_v22 = vpop.xlane.xlu0 %69 }
  0xca   :  { %v71_v23 = vadd.f32 %v70_v22, %v65_v21 }
  0xcc   :  { %72 = vst.msk [vmem:[#allocation3] sm:$0xff] %vm39_vm0, %v71_v23 }
  0xcd   :  { %v61_v25 = vpop.xlane.xlu0 %60 }
  0xce   :  { %v62_v26 = vadd.f32 %v61_v25, %v56_v24 }
  0xd0   :  { %64 = vst.msk [vmem:[#allocation2] sm:$0xff] %vm39_vm0, %v62_v26 }
  0xd3   :  { %v79_v27 = vld [vmem:[#allocation3] sm:$0xff] }
  0xd4   :  { %v80_v28 = vadd.f32 1.0, %v79_v27 }
  0xd6   :  { %101 = vrcp.f32 %v80_v28 }
  0xd7   :  { %v76_v29 = vld [vmem:[#allocation2] sm:$0xff] }
  0xd8   :  { %v77_v30 = vmul.f32 2.0, %v76_v29 }
  0xda   :  { %v78_v31 = vadd.f32 1.0, %v77_v30 }
  0xe3   :  { %v102_v32 = vpop.eup %101 }
  0xe4   :  { %v82_v33 = vmul.f32 %v102_v32, %v78_v31 }
  0xe6   :  { %83 = vst.msk [vmem:[%s181_s2] sm:$0xff] %vm39_vm0, %v82_v33 }
  0xe7   :  { %88 = vsyncpa [#allocation5], 1 }
  0xe8   :  { %89 = vsyncpa [#allocation7], 1 }

</bundles_post_ra>
